<compile_context>
chip_gen: v7x
topology: tpu7x:2x2x1
jax: 0.10.0
libtpu: 0.0.40
codegen_flags: <defaults>
</compile_context>

<pallas_src>
import jax
import jax.numpy as jnp
from jax import lax
from jax.experimental import pallas as pl
from jax.experimental.pallas import tpu as pltpu

NUM_CLS = 4
IMG_C, IMG_H, IMG_W = 4, 8, 8
FEAT_D = IMG_C * IMG_H * IMG_W            # 256
HID = 128                                 # penultimate ("embDim") feature size
CLS_PAD = 128                             # class dim padded to a full lane width
EMB_PAD = NUM_CLS * HID + CLS_PAD         # 640 = 5*128, lane-aligned grad-embedding dim
NEG_BIAS = -1e9                           # bias for padded (nonexistent) classes
NEG_INF = -1e30
# Scoped VMEM budget: safe on v5e/v6e (128 MiB physical) and v7x (64 MiB physical) with
# double-buffer headroom.  Working sets here are far below it.
VMEM_LIMIT = 32 * 1024 * 1024


# --------------------------------------------------------------------------
# helpers
# --------------------------------------------------------------------------
def _round_up(x, m):
    return ((x + m - 1) // m) * m


def _pad_rows(x, n_pad):
    n = x.shape[0]
    if n == n_pad:
        return x
    pad = [(0, n_pad - n)] + [(0, 0)] * (x.ndim - 1)
    return jnp.pad(x, pad)


def _pad_head(w2, b2):
    """Pad the classifier head (HID, C) / (1, C) to a 128-wide class dim.

    Padded columns get zero weights and a very negative bias, so their softmax
    probability underflows to exactly 0 and argmax never picks them."""
    c = w2.shape[1]
    w2p = jnp.zeros((w2.shape[0], CLS_PAD), jnp.float32).at[:, :c].set(w2)
    b2p = jnp.full((1, CLS_PAD), NEG_BIAS, jnp.float32).at[:, :c].set(
        b2.reshape(1, -1))
    return w2p, b2p


# --------------------------------------------------------------------------
# Kernel A (fused): MLP forward + "bias_linear" gradient embedding, L2-normalized,
# stored in bf16.
#   g = softmax(logits) - onehot ; emb = [g_0*h | ... | g_{C-1}*h | g_pad] / ||emb||
#   ||emb||^2 = ||g||^2 * (||h||^2 + 1)  (padded columns are exactly zero)
# --------------------------------------------------------------------------
def _fused_embed_body(x, onehot, w1, b1, w2p, b2p, emb_ref, compute_pred):
    h = jnp.maximum(
        jnp.dot(x, w1, preferred_element_type=jnp.float32) + b1, 0.0)         # [m, HID]
    logits = jnp.dot(h, w2p, preferred_element_type=jnp.float32) + b2p        # [m, CLS_PAD]
    mx = jnp.max(logits, axis=-1, keepdims=True)
    e = jnp.exp(logits - mx)
    # EUP reciprocal instead of a VALU divide (separate VLIW slot).
    p = e * pl.reciprocal(jnp.sum(e, axis=-1, keepdims=True), approx=True)    # pads -> 0
    if compute_pred:
        # pseudo-label one-hot = one_hot(argmax(logits)); first-max tie-break.
        lane = lax.broadcasted_iota(jnp.int32, logits.shape, 1)
        pred = jnp.min(jnp.where(logits == mx, lane, CLS_PAD), axis=-1, keepdims=True)
        onehot = (lane == pred).astype(jnp.float32)
    g = p - onehot                                                            # [m, CLS_PAD], pads 0
    # fold the cosine L2-normalization into the embed kernel
    g2 = jnp.sum(g * g, axis=-1, keepdims=True)
    h2 = jnp.sum(h * h, axis=-1, keepdims=True)
    scale = lax.rsqrt(g2 * (h2 + 1.0) + 1e-12)
    gs = g * scale
    # TODO(synk): per-class lane-broadcast loop is fine at C=4; restructure (diag-select
    # matmul) if the class count grows.
    for j in range(NUM_CLS):                                                  # last-layer weight grads
        emb_ref[:, j * HID:(j + 1) * HID] = (gs[:, j:j + 1] * h).astype(emb_ref.dtype)
    emb_ref[:, NUM_CLS * HID:] = gs.astype(emb_ref.dtype)                     # last-layer bias grads


def _embed_pred_kernel(x_ref, w1_ref, b1_ref, w2_ref, b2_ref, emb_ref):
    _fused_embed_body(x_ref[...], None, w1_ref[...], b1_ref[...],
                      w2_ref[...], b2_ref[...], emb_ref, True)


def _embed_label_kernel(x_ref, oh_ref, w1_ref, b1_ref, w2_ref, b2_ref, emb_ref):
    _fused_embed_body(x_ref[...], oh_ref[...], w1_ref[...], b1_ref[...],
                      w2_ref[...], b2_ref[...], emb_ref, False)


def grad_embeddings(x_flat, params, onehot=None, row_tile=None, n_pad=None):
    """Fused MLP forward + normalized gradient embedding (bf16, row-padded).

    onehot=None -> pseudo-labels (argmax).  The output STAYS padded; downstream
    kernels consume it directly (padded rows are masked in the greedy)."""
    w1, b1, w2, b2 = params
    n, d = x_flat.shape
    if row_tile is None:
        row_tile = min(512, _round_up(n, 16))     # 16-aligned so bf16 blocks are legal
    if n_pad is None:
        n_pad = _round_up(n, row_tile)
    assert n_pad % row_tile == 0
    x_p = _pad_rows(x_flat, n_pad)                # TODO(synk): tail-only padding for huge pools
    w2p, b2p = _pad_head(w2, b2)
    b1r = b1.reshape(1, -1)

    base_specs = [
        pl.BlockSpec((row_tile, d), lambda i: (i, 0)),      # x tile
        pl.BlockSpec((d, HID), lambda i: (0, 0)),           # w1 (resident)
        pl.BlockSpec((1, HID), lambda i: (0, 0)),           # b1
        pl.BlockSpec((HID, CLS_PAD), lambda i: (0, 0)),     # w2 (padded)
        pl.BlockSpec((1, CLS_PAD), lambda i: (0, 0)),       # b2 (padded)
    ]
    if onehot is None:
        kernel = _embed_pred_kernel
        in_specs = base_specs
        inputs = (x_p, w1, b1r, w2p, b2p)
    else:
        oh_p = jnp.zeros((n_pad, CLS_PAD), jnp.float32).at[:n, :onehot.shape[1]].set(onehot)
        kernel = _embed_label_kernel
        in_specs = ([base_specs[0],
                     pl.BlockSpec((row_tile, CLS_PAD), lambda i: (i, 0))]
                    + base_specs[1:])
        inputs = (x_p, oh_p, w1, b1r, w2p, b2p)

    return pl.pallas_call(
        kernel,
        out_shape=jax.ShapeDtypeStruct((n_pad, EMB_PAD), jnp.bfloat16),
        grid=(n_pad // row_tile,),
        in_specs=in_specs,
        out_specs=pl.BlockSpec((row_tile, EMB_PAD), lambda i: (i, 0)),
        compiler_params=pltpu.CompilerParams(
            dimension_semantics=("parallel",),
            vmem_limit_bytes=VMEM_LIMIT),
    )(*inputs)


# --------------------------------------------------------------------------
# Kernel B: cosine-similarity kernel (embeddings already L2-normalized ->
#           a pure bf16 MXU matmul with f32 accumulate, lane-dense output).
# --------------------------------------------------------------------------
def _cosine_kernel(u_ref, qt_ref, s_ref):
    s_ref[...] = jnp.dot(u_ref[...], qt_ref[...], preferred_element_type=jnp.float32)


def cosine_sims(unlab_emb_pad, query_emb_t):
    """unlab_emb_pad: (nu_pad, EMB_PAD) bf16, normalized; query_emb_t: (EMB_PAD, nq_pad) bf16."""
    nu_pad, d = unlab_emb_pad.shape
    nq_pad = query_emb_t.shape[1]
    if nu_pad % 1024 == 0:
        tile = 1024
    elif nu_pad % 512 == 0:
        tile = 512
    else:
        tile = nu_pad
    return pl.pallas_call(
        _cosine_kernel,
        out_shape=jax.ShapeDtypeStruct((nu_pad, nq_pad), jnp.float32),
        grid=(nu_pad // tile,),
        in_specs=[pl.BlockSpec((tile, d), lambda i: (i, 0)),
                  pl.BlockSpec((d, nq_pad), lambda i: (0, 0))],   # resident transposed queries
        out_specs=pl.BlockSpec((tile, nq_pad), lambda i: (i, 0)),
        compiler_params=pltpu.CompilerParams(
            dimension_semantics=("parallel",),
            vmem_limit_bytes=VMEM_LIMIT),
    )(unlab_emb_pad, query_emb_t)


# --------------------------------------------------------------------------
# Kernel C: fl2mi greedy (FacilityLocationVariantMutualInformation, eta=1) for ALL
#           classes, with S resident in VMEM.
#   gain(j | A) = sum_{q in Q_c} max(0, S_jq - qMax_q) + eta * max_{q in Q_c} S_jq
#   Padded unlabeled rows are masked (never selected); padded query columns have an
#   all-zero class mask and contribute nothing.
# --------------------------------------------------------------------------
def _make_greedy_kernel(num_valid, budget, eta):
    def kernel(s_ref, qmask_ref, idx_ref, gain_ref):
        s = s_ref[...]                                           # (nu_pad, nq_pad) f32, resident
        nu_pad, nq_pad = s.shape
        row_id = lax.broadcasted_iota(jnp.int32, (nu_pad, 1), 0)
        valid = row_id < num_valid
        neg = jnp.float32(NEG_INF)
        out_r = lax.broadcasted_iota(jnp.int32, idx_ref.shape, 0)
        out_c = lax.broadcasted_iota(jnp.int32, idx_ref.shape, 1)
        idx_acc = jnp.zeros(idx_ref.shape, jnp.int32)
        gain_acc = jnp.zeros(gain_ref.shape, jnp.float32)
        for c in range(NUM_CLS):
            qrow = qmask_ref[c:c + 1, :]                         # (1, nq_pad)
            qm = qrow > 0.5
            has_q = jnp.sum(qrow) > 0.0
            eta_term = eta * jnp.max(jnp.where(qm, s, neg), axis=1, keepdims=True)
            eta_term = jnp.where(has_q, eta_term, 0.0)           # (nu_pad, 1)
            qmax = jnp.zeros((1, nq_pad), jnp.float32)
            taken = row_id < 0                                   # all-False
            # TODO(synk): Python-unrolled over the (small) per-class budget; switch to
            # pl.loop + SMEM-indexed outputs for large budgets.
            for t in range(budget):
                rel = jnp.where(qm, jnp.maximum(s - qmax, 0.0), 0.0)
                gain = jnp.sum(rel, axis=1, keepdims=True) + eta_term
                gain = jnp.where(jnp.logical_and(valid, jnp.logical_not(taken)), gain, neg)
                best = jnp.max(gain)
                j = jnp.min(jnp.where(gain == best, row_id, nu_pad)).astype(jnp.int32)
                sel = jnp.logical_and(out_r == c, out_c == t)
                idx_acc = jnp.where(sel, j, idx_acc)
                gain_acc = jnp.where(sel, best, gain_acc)
                s_row = jnp.sum(jnp.where(row_id == j, s, 0.0), axis=0, keepdims=True)
                qmax = jnp.maximum(qmax, s_row)
                taken = jnp.logical_or(taken, row_id == j)
        idx_ref[...] = idx_acc
        gain_ref[...] = gain_acc
    return kernel


def fl2mi_greedy(sijs_pad, qmask, num_valid, budget, eta=1.0):
    """sijs_pad: (nu_pad, nq_pad) f32; qmask: (8, nq_pad) f32 per-class query masks."""
    # TODO(synk): for very large unlabeled pools, tile S over nu inside the greedy
    # (blockwise argmax) instead of one resident block.
    nu_pad, nq_pad = sijs_pad.shape
    assert budget <= 128 and NUM_CLS <= 8
    kernel = _make_greedy_kernel(int(num_valid), int(budget), float(eta))
    idx_full, gain_full = pl.pallas_call(
        kernel,
        out_shape=(jax.ShapeDtypeStruct((8, 128), jnp.int32),
                   jax.ShapeDtypeStruct((8, 128), jnp.float32)),
        grid=(1,),
        in_specs=[pl.BlockSpec((nu_pad, nq_pad), lambda i: (0, 0)),
                  pl.BlockSpec((8, nq_pad), lambda i: (0, 0))],
        out_specs=(pl.BlockSpec((8, 128), lambda i: (0, 0)),
                   pl.BlockSpec((8, 128), lambda i: (0, 0))),
        compiler_params=pltpu.CompilerParams(vmem_limit_bytes=VMEM_LIMIT),
    )(sijs_pad, qmask)
    return idx_full[:NUM_CLS, :budget], gain_full[:NUM_CLS, :budget]


# --------------------------------------------------------------------------
# Kernel D (fused): MLP forward + pseudo-label cross-entropy loss of the
#                   selected samples:  sum_i -(p_target_i * log_softmax(logits_i)).
#   Padded rows have an all-zero target -> contribute exactly 0.
# --------------------------------------------------------------------------
def _mlp_xent_kernel(x_ref, oh_ref, w1_ref, b1_ref, w2_ref, b2_ref, loss_ref):
    x = x_ref[...]
    h = jnp.maximum(
        jnp.dot(x, w1_ref[...], preferred_element_type=jnp.float32) + b1_ref[...], 0.0)
    logits = jnp.dot(h, w2_ref[...], preferred_element_type=jnp.float32) + b2_ref[...]
    m = jnp.max(logits, axis=-1, keepdims=True)
    lse = jnp.log(jnp.sum(jnp.exp(logits - m), axis=-1, keepdims=True)) + m
    logp = logits - lse
    losses = -jnp.sum(oh_ref[...] * logp, axis=-1, keepdims=True)   # [n_pad, 1]
    loss_ref[...] = jnp.sum(losses, axis=0, keepdims=True)


def pseudo_label_loss(x_flat, onehot, params):
    w1, b1, w2, b2 = params
    n, d = x_flat.shape
    n_pad = _round_up(max(n, 8), 8)
    x_p = _pad_rows(x_flat, n_pad)
    oh_p = jnp.zeros((n_pad, CLS_PAD), jnp.float32).at[:n, :onehot.shape[1]].set(onehot)
    w2p, b2p = _pad_head(w2, b2)
    out = pl.pallas_call(
        _mlp_xent_kernel,
        out_shape=jax.ShapeDtypeStruct((1, 1), jnp.float32),
        grid=(1,),
        in_specs=[pl.BlockSpec((n_pad, d), lambda i: (0, 0)),
                  pl.BlockSpec((n_pad, CLS_PAD), lambda i: (0, 0)),
                  pl.BlockSpec((d, HID), lambda i: (0, 0)),
                  pl.BlockSpec((1, HID), lambda i: (0, 0)),
                  pl.BlockSpec((HID, CLS_PAD), lambda i: (0, 0)),
                  pl.BlockSpec((1, CLS_PAD), lambda i: (0, 0))],
        out_specs=pl.BlockSpec((1, 1), lambda i: (0, 0)),
        compiler_params=pltpu.CompilerParams(vmem_limit_bytes=VMEM_LIMIT),
    )(x_p, oh_p, w1, b1.reshape(1, -1), w2p, b2p)
    return out[0, 0] / n


# --------------------------------------------------------------------------
# SMIselection forward (JAX / Pallas version)
# --------------------------------------------------------------------------
class SMISelectionPallas:
    def __init__(self, num_cls, select_true_label, scenario, selection_option,
                 is_inner, verbose, freeze=True):
        assert num_cls == NUM_CLS
        self.num_cls = num_cls
        self.select_true_label = select_true_label
        self.scenario = scenario
        self.verbose = verbose
        self.selection_option = selection_option
        self.is_inner = is_inner
        self.freeze = freeze

    def forward(self, support_inputs, support_targets, query_inputs, query_targets,
                unlabeled_inputs, unlabeled_targets, outputs_unlabeled, model, params,
                meta_train, excluded=(), strategy_args=None, epoch=None):
        strategy_args = dict(strategy_args or {})
        if excluded:
            n = int(unlabeled_targets.shape[0])
            rest = sorted(set(range(n)) - set(excluded))
            rest = jnp.asarray(rest, jnp.int32)
            unlabeled_inputs = unlabeled_inputs[rest]
            unlabeled_targets = unlabeled_targets[rest]
            strategy_args['batch_size'] = int(rest.shape[0])

        selected_idx, selected_pls, selected_gains = self.smi_select(
            support_inputs, support_targets, query_inputs, query_targets,
            unlabeled_inputs, unlabeled_targets, params,
            meta_train=meta_train, strategy_args=strategy_args, epoch=epoch)
        if self.verbose:
            print('\nselected indices: ', selected_idx)

        selected_idx_arr = jnp.asarray(selected_idx, jnp.int32)
        selected_pls_arr = jnp.asarray(selected_pls, jnp.int32)
        loss_unlabel, select_stat = self.smi_pl_loss(
            unlabeled_inputs, unlabeled_targets, selected_idx_arr,
            selected_pls_arr, selected_gains, params, self.freeze)
        return loss_unlabel, select_stat, selected_idx

    def smi_select(self, support_inputs, support_targets, query_inputs, query_targets,
                   unlabeled_inputs, unlabeled_targets, params,
                   meta_train=True, strategy_args=None, epoch=None):
        strategy_args = strategy_args or {}
        # select the SMI query set
        if meta_train:
            if self.selection_option == 'same':
                qi, qt = ((support_inputs, support_targets) if self.is_inner
                          else (query_inputs, query_targets))
            elif self.selection_option == 'cross':
                qi, qt = ((query_inputs, query_targets) if self.is_inner
                          else (support_inputs, support_targets))
            else:  # 'union'
                qi = jnp.concatenate([support_inputs, query_inputs], 0)
                qt = jnp.concatenate([support_targets, query_targets], 0)
        else:
            qi, qt = support_inputs, support_targets

        smi_function = strategy_args.get('smi_function', 'fl2mi')
        if epoch is None:
            embedding_type = strategy_args.get('embedding_type', 'gradients')
        else:
            embedding_type = 'gradients' if epoch < 300 else 'classScores'
        # TODO(synk): only the default fl2mi + gradients path is implemented
        # (fl1mi / gcmi / logdetmi and classScores embeddings are not).
        assert smi_function == 'fl2mi' and embedding_type == 'gradients'

        u_flat = unlabeled_inputs.reshape(unlabeled_inputs.shape[0], -1)
        q_flat = qi.reshape(qi.shape[0], -1)
        nu, nq = u_flat.shape[0], q_flat.shape[0]
        nq_pad = _round_up(nq, 128)                       # lane-dense S output columns

        # fused grad-embedding kernels (normalized bf16, padded; no slicing afterwards)
        unlab_emb = grad_embeddings(u_flat, params)                           # (nu_pad, 640)
        q_onehot = jax.nn.one_hot(qt, self.num_cls, dtype=jnp.float32)
        query_emb = grad_embeddings(q_flat, params, onehot=q_onehot,
                                    row_tile=128, n_pad=nq_pad)               # (nq_pad, 640)
        query_emb_t = jnp.transpose(query_emb)                                # tiny (640, nq_pad)

        # query_sijs: cosine-similarity kernel, stays padded [nu_pad, nq_pad]
        sijs = cosine_sims(unlab_emb, query_emb_t)

        budget_per_class = int(strategy_args['budget'] / self.num_cls)
        # per-class query-column masks (padded query columns -> label -1 -> never match)
        qt_pad = jnp.full((nq_pad,), -1, jnp.int32).at[:nq].set(qt.astype(jnp.int32))
        qmask = (qt_pad[None, :] ==
                 jnp.arange(8, dtype=jnp.int32)[:, None]).astype(jnp.float32)

        # on-chip fl2mi greedy over all classes with S resident in VMEM
        idxs_all, gains_all = fl2mi_greedy(sijs, qmask, num_valid=nu,
                                           budget=budget_per_class, eta=1.0)
        idxs_host, gains_host = jax.device_get((idxs_all, gains_all))   # single host sync

        select_idx = [int(i) for i in idxs_host.reshape(-1)]
        select_gains = [float(g) for g in gains_host.reshape(-1)]
        select_pls = [c for c in range(self.num_cls) for _ in range(budget_per_class)]
        select_gains_5 = [float('%.5f' % g) for g in select_gains]
        return select_idx, select_pls, select_gains_5

    def smi_pl_loss(self, unlabeled_inputs, unlabeled_targets, selected_idx,
                    selected_pseudolabels, selected_gains, params, freeze):
        # TODO(synk): `freeze` only affects gradient flow in PyTorch; forward is identical.
        gt_mask = jnp.zeros_like(unlabeled_targets).at[selected_idx].set(1)
        num_unlabeled = int(unlabeled_targets.shape[0])
        num_select = int(selected_idx.shape[0])
        selected_targets = unlabeled_targets[selected_idx]

        num_oods_select = 0
        if self.scenario == 'distractor':
            labels_unlabeled_select = unlabeled_targets * gt_mask
            num_oods_select = int((labels_unlabeled_select == -1).sum())
        select_stat = None
        if self.scenario in ['woDistractor', 'distractor', 'imbalance']:
            nswd, nsc, st_host = jax.device_get(
                (gt_mask.sum(), jnp.sum(selected_targets == selected_pseudolabels),
                 selected_targets))
            select_stat = '{}, {}, {}, {}, {}, {}, {}'.format(
                int(nsc), int(nswd), num_select, num_unlabeled, num_oods_select,
                st_host, selected_gains)
            if self.verbose:
                print(f'+++++ Some statistics in the selection: {select_stat}')

        selected_samples = unlabeled_inputs[selected_idx]
        s_flat = selected_samples.reshape(num_select, -1)
        if self.select_true_label:
            p_target = jax.nn.one_hot(selected_targets, self.num_cls, dtype=jnp.float32)
        else:
            p_target = jax.nn.one_hot(selected_pseudolabels, self.num_cls, dtype=jnp.float32)
        loss_selected = pseudo_label_loss(s_flat, p_target, params)
        if self.verbose:
            print('+++++ SMI the SSL loss : {:.8f}.\n'.format(float(loss_selected)))
        return loss_selected, select_stat


if __name__ == "__main__":
    key = jax.random.PRNGKey(0)
    k = jax.random.split(key, 8)

    n_support, n_query, n_unlabeled = 8, 8, 32
    support_inputs = jax.random.normal(k[0], (n_support, IMG_C, IMG_H, IMG_W), jnp.float32)
    query_inputs = jax.random.normal(k[1], (n_query, IMG_C, IMG_H, IMG_W), jnp.float32)
    unlabeled_inputs = jax.random.normal(k[2], (n_unlabeled, IMG_C, IMG_H, IMG_W), jnp.float32)
    support_targets = jnp.arange(n_support, dtype=jnp.int32) % NUM_CLS
    query_targets = jnp.arange(n_query, dtype=jnp.int32) % NUM_CLS
    unlabeled_targets = jax.random.randint(k[3], (n_unlabeled,), 0, NUM_CLS, jnp.int32)

    # deterministic synthetic model parameters (2-layer MLP "model")
    w1 = 0.05 * jax.random.normal(k[4], (FEAT_D, HID), jnp.float32)
    b1 = jnp.zeros((1, HID), jnp.float32)
    w2 = 0.05 * jax.random.normal(k[5], (HID, NUM_CLS), jnp.float32)
    b2 = jnp.zeros((1, NUM_CLS), jnp.float32)
    params = (w1, b1, w2, b2)

    strategy_args = {'budget': 8, 'device': None, 'smi_function': 'fl2mi',
                     'embedding_type': 'gradients', 'batch_size': n_unlabeled}

    smi = SMISelectionPallas(num_cls=NUM_CLS, select_true_label=False,
                             scenario='woDistractor', selection_option='same',
                             is_inner=False, verbose=False, freeze=True)

    loss, stat, selected_idx = smi.forward(
        support_inputs, support_targets, query_inputs, query_targets,
        unlabeled_inputs, unlabeled_targets, None, None, params,
        meta_train=True, excluded=(), strategy_args=strategy_args, epoch=None)

    jax.block_until_ready(loss)
    print("KERNEL_OK")
</pallas_src>

<mosaic_0001>
module attributes {stable_mosaic.version = 11 : i64} {
  func.func @_embed_pred_kernel(%arg0: i32, %arg1: memref<32x256xf32, #tpu.memory_space<vmem>>, %arg2: memref<256x128xf32, #tpu.memory_space<vmem>>, %arg3: memref<1x128xf32, #tpu.memory_space<vmem>>, %arg4: memref<128x128xf32, #tpu.memory_space<vmem>>, %arg5: memref<1x128xf32, #tpu.memory_space<vmem>>, %arg6: memref<32x640xbf16, #tpu.memory_space<vmem>>) attributes {dimension_semantics = [#tpu.dimension_semantics<parallel>], iteration_bounds = array<i64: 1>, scalar_prefetch = 0 : i64, scratch_operands = 0 : i64, tpu.core_type = #tpu.core_type<tc>, window_params = [{transform_indices = @transform_0, window_bounds = array<i64: 32, 256>}, {pipeline_mode = #tpu.pipeline_mode<synchronous>, transform_indices = @transform_1, window_bounds = array<i64: 256, 128>}, {pipeline_mode = #tpu.pipeline_mode<synchronous>, transform_indices = @transform_2, window_bounds = array<i64: 1, 128>}, {pipeline_mode = #tpu.pipeline_mode<synchronous>, transform_indices = @transform_3, window_bounds = array<i64: 128, 128>}, {pipeline_mode = #tpu.pipeline_mode<synchronous>, transform_indices = @transform_4, window_bounds = array<i64: 1, 128>}, {transform_indices = @transform_5, window_bounds = array<i64: 32, 640>}]} {
    %c0 = arith.constant 0 : index
    %c0_0 = arith.constant 0 : index
    %0 = vector.load %arg1[%c0, %c0_0] : memref<32x256xf32, #tpu.memory_space<vmem>>, vector<32x256xf32>
    %c0_1 = arith.constant 0 : index
    %c0_2 = arith.constant 0 : index
    %1 = vector.load %arg2[%c0_1, %c0_2] : memref<256x128xf32, #tpu.memory_space<vmem>>, vector<256x128xf32>
    %c0_3 = arith.constant 0 : index
    %c0_4 = arith.constant 0 : index
    %2 = vector.load %arg3[%c0_3, %c0_4] : memref<1x128xf32, #tpu.memory_space<vmem>>, vector<1x128xf32>
    %c0_5 = arith.constant 0 : index
    %c0_6 = arith.constant 0 : index
    %3 = vector.load %arg4[%c0_5, %c0_6] : memref<128x128xf32, #tpu.memory_space<vmem>>, vector<128x128xf32>
    %c0_7 = arith.constant 0 : index
    %c0_8 = arith.constant 0 : index
    %4 = vector.load %arg5[%c0_7, %c0_8] : memref<1x128xf32, #tpu.memory_space<vmem>>, vector<1x128xf32>
    %cst = arith.constant dense<0.000000e+00> : vector<32x128xf32>
    %5 = tpu.matmul %0, %1, %cst {dimension_numbers = #tpu.dot_dimension_numbers<[1], [0], [0], [1], [0, 0, 1, 1], [], []>} : vector<32x256xf32>, vector<256x128xf32>, vector<32x128xf32> -> vector<32x128xf32>
    %6 = vector.broadcast %2 : vector<1x128xf32> to vector<32x128xf32>
    %7 = arith.addf %5, %6 : vector<32x128xf32>
    %cst_9 = arith.constant 0.000000e+00 : f32
    %8 = vector.broadcast %cst_9 : f32 to vector<32x128xf32>
    %9 = arith.maximumf %7, %8 : vector<32x128xf32>
    %cst_10 = arith.constant dense<0.000000e+00> : vector<32x128xf32>
    %10 = tpu.matmul %9, %3, %cst_10 {dimension_numbers = #tpu.dot_dimension_numbers<[1], [0], [0], [1], [0, 0, 1, 1], [], []>} : vector<32x128xf32>, vector<128x128xf32>, vector<32x128xf32> -> vector<32x128xf32>
    %11 = vector.broadcast %4 : vector<1x128xf32> to vector<32x128xf32>
    %12 = arith.addf %10, %11 : vector<32x128xf32>
    %cst_11 = arith.constant dense<0xFF800000> : vector<32xf32>
    %13 = vector.multi_reduction <maximumf>, %12, %cst_11 [1] : vector<32x128xf32> to vector<32xf32>
    %14 = vector.shape_cast %13 : vector<32xf32> to vector<32x1xf32>
    %15 = vector.broadcast %14 : vector<32x1xf32> to vector<32x128xf32>
    %16 = arith.subf %12, %15 : vector<32x128xf32>
    %17 = math.exp %16 : vector<32x128xf32>
    %cst_12 = arith.constant dense<0.000000e+00> : vector<32xf32>
    %18 = vector.multi_reduction <add>, %17, %cst_12 [1] : vector<32x128xf32> to vector<32xf32>
    %19 = vector.shape_cast %18 : vector<32xf32> to vector<32x1xf32>
    %20 = tpu.reciprocal %19 {approx = true} : vector<32x1xf32> -> vector<32x1xf32>
    %21 = vector.broadcast %20 : vector<32x1xf32> to vector<32x128xf32>
    %22 = arith.mulf %17, %21 : vector<32x128xf32>
    %23 = tpu.iota {dimensions = array<i32: 1>} : vector<32x128xi32>
    %24 = vector.broadcast %14 : vector<32x1xf32> to vector<32x128xf32>
    %25 = arith.cmpf oeq, %12, %24 : vector<32x128xf32>
    %c128_i32 = arith.constant 128 : i32
    %26 = vector.broadcast %c128_i32 : i32 to vector<32x128xi32>
    %27 = arith.select %25, %23, %26 : vector<32x128xi1>, vector<32x128xi32>
    %cst_13 = arith.constant dense<2147483647> : vector<32xi32>
    %28 = vector.multi_reduction <minsi>, %27, %cst_13 [1] : vector<32x128xi32> to vector<32xi32>
    %29 = vector.shape_cast %28 : vector<32xi32> to vector<32x1xi32>
    %30 = vector.broadcast %29 : vector<32x1xi32> to vector<32x128xi32>
    %31 = arith.cmpi eq, %23, %30 : vector<32x128xi32>
    %32 = arith.extui %31 : vector<32x128xi1> to vector<32x128xi32>
    %33 = arith.sitofp %32 : vector<32x128xi32> to vector<32x128xf32>
    %34 = arith.subf %22, %33 : vector<32x128xf32>
    %35 = arith.mulf %34, %34 : vector<32x128xf32>
    %cst_14 = arith.constant dense<0.000000e+00> : vector<32xf32>
    %36 = vector.multi_reduction <add>, %35, %cst_14 [1] : vector<32x128xf32> to vector<32xf32>
    %37 = vector.shape_cast %36 : vector<32xf32> to vector<32x1xf32>
    %38 = arith.mulf %9, %9 : vector<32x128xf32>
    %cst_15 = arith.constant dense<0.000000e+00> : vector<32xf32>
    %39 = vector.multi_reduction <add>, %38, %cst_15 [1] : vector<32x128xf32> to vector<32xf32>
    %40 = vector.shape_cast %39 : vector<32xf32> to vector<32x1xf32>
    %cst_16 = arith.constant 1.000000e+00 : f32
    %41 = vector.broadcast %cst_16 : f32 to vector<32x1xf32>
    %42 = arith.addf %40, %41 : vector<32x1xf32>
    %43 = arith.mulf %37, %42 : vector<32x1xf32>
    %cst_17 = arith.constant 9.99999996E-13 : f32
    %44 = vector.broadcast %cst_17 : f32 to vector<32x1xf32>
    %45 = arith.addf %43, %44 : vector<32x1xf32>
    %46 = math.rsqrt %45 : vector<32x1xf32>
    %47 = vector.broadcast %46 : vector<32x1xf32> to vector<32x128xf32>
    %48 = arith.mulf %34, %47 : vector<32x128xf32>
    %49 = vector.extract_strided_slice %48 {offsets = [0, 0], sizes = [32, 1], strides = [1, 1]} : vector<32x128xf32> to vector<32x1xf32>
    %50 = vector.broadcast %49 : vector<32x1xf32> to vector<32x128xf32>
    %51 = arith.mulf %50, %9 : vector<32x128xf32>
    %52 = arith.truncf %51 : vector<32x128xf32> to vector<32x128xbf16>
    %c0_18 = arith.constant 0 : index
    %c0_19 = arith.constant 0 : index
    %53 = vector.load %arg6[%c0_18, %c0_19] : memref<32x640xbf16, #tpu.memory_space<vmem>>, vector<32x128xbf16>
    tpu.vector_store %arg6[%c0_18, %c0_19], %52 {strides = array<i32>} : memref<32x640xbf16, #tpu.memory_space<vmem>>, vector<32x128xbf16>,
    %54 = vector.extract_strided_slice %48 {offsets = [0, 1], sizes = [32, 1], strides = [1, 1]} : vector<32x128xf32> to vector<32x1xf32>
    %55 = vector.broadcast %54 : vector<32x1xf32> to vector<32x128xf32>
    %56 = arith.mulf %55, %9 : vector<32x128xf32>
    %57 = arith.truncf %56 : vector<32x128xf32> to vector<32x128xbf16>
    %c0_20 = arith.constant 0 : index
    %c128 = arith.constant 128 : index
    %58 = vector.load %arg6[%c0_20, %c128] : memref<32x640xbf16, #tpu.memory_space<vmem>>, vector<32x128xbf16>
    tpu.vector_store %arg6[%c0_20, %c128], %57 {strides = array<i32>} : memref<32x640xbf16, #tpu.memory_space<vmem>>, vector<32x128xbf16>,
    %59 = vector.extract_strided_slice %48 {offsets = [0, 2], sizes = [32, 1], strides = [1, 1]} : vector<32x128xf32> to vector<32x1xf32>
    %60 = vector.broadcast %59 : vector<32x1xf32> to vector<32x128xf32>
    %61 = arith.mulf %60, %9 : vector<32x128xf32>
    %62 = arith.truncf %61 : vector<32x128xf32> to vector<32x128xbf16>
    %c0_21 = arith.constant 0 : index
    %c256 = arith.constant 256 : index
    %63 = vector.load %arg6[%c0_21, %c256] : memref<32x640xbf16, #tpu.memory_space<vmem>>, vector<32x128xbf16>
    tpu.vector_store %arg6[%c0_21, %c256], %62 {strides = array<i32>} : memref<32x640xbf16, #tpu.memory_space<vmem>>, vector<32x128xbf16>,
    %64 = vector.extract_strided_slice %48 {offsets = [0, 3], sizes = [32, 1], strides = [1, 1]} : vector<32x128xf32> to vector<32x1xf32>
    %65 = vector.broadcast %64 : vector<32x1xf32> to vector<32x128xf32>
    %66 = arith.mulf %65, %9 : vector<32x128xf32>
    %67 = arith.truncf %66 : vector<32x128xf32> to vector<32x128xbf16>
    %c0_22 = arith.constant 0 : index
    %c384 = arith.constant 384 : index
    %68 = vector.load %arg6[%c0_22, %c384] : memref<32x640xbf16, #tpu.memory_space<vmem>>, vector<32x128xbf16>
    tpu.vector_store %arg6[%c0_22, %c384], %67 {strides = array<i32>} : memref<32x640xbf16, #tpu.memory_space<vmem>>, vector<32x128xbf16>,
    %69 = arith.truncf %48 : vector<32x128xf32> to vector<32x128xbf16>
    %c0_23 = arith.constant 0 : index
    %c512 = arith.constant 512 : index
    %70 = vector.load %arg6[%c0_23, %c512] : memref<32x640xbf16, #tpu.memory_space<vmem>>, vector<32x128xbf16>
    tpu.vector_store %arg6[%c0_23, %c512], %69 {strides = array<i32>} : memref<32x640xbf16, #tpu.memory_space<vmem>>, vector<32x128xbf16>,
    return
  }
  func.func @transform_0(%arg0: i32) -> (i32, i32) {
    %c0_i32 = arith.constant 0 : i32
    %c0_i32_0 = arith.constant 0 : i32
    return %arg0, %c0_i32 : i32, i32
  }
  func.func @transform_1(%arg0: i32) -> (i32, i32) {
    %c0_i32 = arith.constant 0 : i32
    %c0_i32_0 = arith.constant 0 : i32
    %c0_i32_1 = arith.constant 0 : i32
    return %c0_i32, %c0_i32_0 : i32, i32
  }
  func.func @transform_2(%arg0: i32) -> (i32, i32) {
    %c0_i32 = arith.constant 0 : i32
    %c0_i32_0 = arith.constant 0 : i32
    %c0_i32_1 = arith.constant 0 : i32
    return %c0_i32, %c0_i32_0 : i32, i32
  }
  func.func @transform_3(%arg0: i32) -> (i32, i32) {
    %c0_i32 = arith.constant 0 : i32
    %c0_i32_0 = arith.constant 0 : i32
    %c0_i32_1 = arith.constant 0 : i32
    return %c0_i32, %c0_i32_0 : i32, i32
  }
  func.func @transform_4(%arg0: i32) -> (i32, i32) {
    %c0_i32 = arith.constant 0 : i32
    %c0_i32_0 = arith.constant 0 : i32
    %c0_i32_1 = arith.constant 0 : i32
    return %c0_i32, %c0_i32_0 : i32, i32
  }
  func.func @transform_5(%arg0: i32) -> (i32, i32) {
    %c0_i32 = arith.constant 0 : i32
    %c0_i32_0 = arith.constant 0 : i32
    return %arg0, %c0_i32 : i32, i32
  }
}

</mosaic_0001>

<bundles_post_ra>
// kernel: tpu_custom_call.1
= control target key start
LH: loop header
LB: loop body
LE: loop exit
PB: predicated region body
PF: predicated region fallthrough
CT: control target
= control target key end

     0   :  { %10 = vsyncpa [#allocation3], 0  ;;  %s1201_s0 = inlined_call_operand.hbm [shape: f32[32,256], index: 0, kind: input, shape index: {}]   ;;  %s1202_s1 = inlined_call_operand.hbm [shape: f32[256,128], index: 1, kind: input, shape index: {}]   ;;  %s1203_s2 = inlined_call_operand.vmem [shape: f32[1,128], index: 2, kind: input, shape index: {}]   ;;  %s1204_s3 = inlined_call_operand.hbm [shape: f32[128,128], index: 3, kind: input, shape index: {}]   ;;  %s1205_s4 = inlined_call_operand.vmem [shape: f32[1,128], index: 4, kind: input, shape index: {}]   ;;  %s1206_s5 = inlined_call_operand.hbm [shape: bf16[32,640], index: 5, kind: output, shape index: {}]  }
   0x1   :  { %11 = vsyncpa [#allocation6], 0 }
   0x2   :  { %12 = vsyncpa [#allocation4], 0  ;;  %s1030_s18 = smov [#allocation5]   ;;  %s936_s22 = scalar_lea.hbm %s1202_s1, 4096 }
   0x3   :  { %s30_s19 = sshll.u32 %s1030_s18, 4  ;;  %p937_p0 = scmp.ne.s32.totalorder %s1202_s1, %s936_s22  ;;  %s31_s19 = int_to_ptr.vmem [resolvable:$true] %s30_s19 }
   0x4   :  { %p940_p1 = scmp.lt.u32.totalorder %s936_s22, %s1202_s1 }
   0x6   :  { %p942_p2 = pnand %p940_p1, %p937_p0 }
   0x8   :  { %945 = shalt.err (!%p942_p2)
}
   0x9   :  { %s946_s27 = scalar_lea.vmem %s31_s19, 4096  ;;  %p951_p4 = scmp.lt.s32.totalorder %s31_s19, %s31_s19 }
   0xa   :  { %p947_p3 = scmp.ne.s32.totalorder %s31_s19, %s946_s27  ;;  %p952_p5 = scmp.lt.s32.totalorder %s946_s27, %s946_s27 }
   0xc   :  { %p953_p6 = por %p952_p5, %p951_p4 }
   0xe   :  { %p954_p7 = pnand %p953_p6, %p947_p3 }
  0x10   :  { %957 = shalt.err (!%p954_p7)
}
  0x11   :  { %s1031_s28 = smov 128   ;;  %s1032_s29 = smov 8  }
  0x12   :  { %36 = dma.hbm_to_vmem [thread:$0]  %s1202_s1, 4096, %s31_s19, [#allocation6], %s1031_s28, %s1031_s28, %s1032_s29  }
  0x13   :  { %s1033_s7 = smov [#allocation2]   ;;  %s958_s11 = scalar_lea.hbm %s1201_s0, 1024 }
  0x14   :  { %s18_s8 = sshll.u32 %s1033_s7, 4  ;;  %p959_p8 = scmp.ne.s32.totalorder %s1201_s0, %s958_s11  ;;  %s19_s8 = int_to_ptr.vmem [resolvable:$true] %s18_s8 }
  0x15   :  { %p962_p9 = scmp.lt.u32.totalorder %s958_s11, %s1201_s0 }
  0x17   :  { %p964_p10 = pnand %p962_p9, %p959_p8 }
  0x19   :  { %967 = shalt.err (!%p964_p10)
}
  0x1a   :  { %s968_s16 = scalar_lea.vmem %s19_s8, 1024  ;;  %p973_p12 = scmp.lt.s32.totalorder %s19_s8, %s19_s8 }
  0x1b   :  { %p969_p11 = scmp.ne.s32.totalorder %s19_s8, %s968_s16  ;;  %p974_p13 = scmp.lt.s32.totalorder %s968_s16, %s968_s16 }
  0x1d   :  { %p975_p0 = por %p974_p13, %p973_p12 }
  0x1f   :  { %p976_p1 = pnand %p975_p0, %p969_p11 }
  0x21   :  { %979 = shalt.err (!%p976_p1)
}
  0x22   :  { %s1034_s1 = smov 256   ;;  %s1035_s17 = smov 16  }
  0x23   :  { %24 = dma.hbm_to_vmem [thread:$0]  %s1201_s0, 1024, %s19_s8, [#allocation3], %s1034_s1, %s1034_s1, %s1035_s17  }
  0x24   :  { %s1036_s20 = smov [#allocation7]   ;;  %s980_s24 = scalar_lea.hbm %s1204_s3, 2048 }
  0x25   :  { %s44_s21 = sshll.u32 %s1036_s20, 4  ;;  %p981_p2 = scmp.ne.s32.totalorder %s1204_s3, %s980_s24  ;;  %s45_s21 = int_to_ptr.vmem [resolvable:$true] %s44_s21 }
  0x26   :  { %p984_p3 = scmp.lt.u32.totalorder %s980_s24, %s1204_s3 }
  0x28   :  { %p986_p4 = pnand %p984_p3, %p981_p2 }
  0x2a   :  { %989 = shalt.err (!%p986_p4)
}
  0x2b   :  { %s990_s6 = scalar_lea.vmem %s45_s21, 2048  ;;  %p995_p6 = scmp.lt.s32.totalorder %s45_s21, %s45_s21 }
  0x2c   :  { %p991_p5 = scmp.ne.s32.totalorder %s45_s21, %s990_s6  ;;  %p996_p7 = scmp.lt.s32.totalorder %s990_s6, %s990_s6 }
  0x2e   :  { %p997_p8 = por %p996_p7, %p995_p6 }
  0x30   :  { %p998_p9 = pnand %p997_p8, %p991_p5 }
  0x32   :  { %1001 = shalt.err (!%p998_p9)
}
  0x33   :  { %50 = dma.hbm_to_vmem [thread:$0]  %s1204_s3, 2048, %s45_s21, [#allocation6], %s1031_s28, %s1031_s28, %s1032_s29  }
  0x34   :  { %1024 = dma.done.wait [#allocation3], 1024  }
  0x35   :  { %1025 = vsyncadd [#allocation3], 4294966272 }
  0x36   :  { %1026 = dma.done.wait [#allocation6], 6144  }
  0x37   :  { %1027 = vsyncadd [#allocation6], 4294961152  ;;  %v86_v0 = vld [vmem:[#allocation5 + $0x80] sm:$0xff]  ;;  %v87_v1 = vld [vmem:[#allocation5 + $0x88] sm:$0xff] }
  0x38   :  { %v70_v2 = vld [vmem:[#allocation5] sm:$0xff]  ;;  %v818_v3 = vpack.c.bf16 %v87_v1, %v86_v0  ;;  %v71_v4 = vld [vmem:[#allocation5 + $0x8] sm:$0xff]  ;;  %v88_v5 = vld [vmem:[#allocation5 + $0x90] sm:$0xff] }
  0x39   :  { %v89_v6 = vld [vmem:[#allocation5 + $0x98] sm:$0xff]  ;;  %v820_v7 = vpack.c.bf16 %v71_v4, %v70_v2  ;;  %v72_v9 = vld [vmem:[#allocation5 + $0x10] sm:$0xff]  ;;  %v90_v11 = vld [vmem:[#allocation5 + $0xa0] sm:$0xff] }
  0x3a   :  { %v822_v8 = vpack.c.bf16 %v89_v6, %v88_v5  ;;  %v73_v10 = vld [vmem:[#allocation5 + $0x18] sm:$0xff]  ;;  %819 = vmatprep.subr.bf16.mxu0 %v818_v3  ;;  %v91_v12 = vld [vmem:[#allocation5 + $0xa8] sm:$0xff]  ;;  %v74_v15 = vld [vmem:[#allocation5 + $0x20] sm:$0xff] }
  0x3b   :  { %821 = vmatpush3.bf16.msra.mxu0 %v820_v7  ;;  %v824_v13 = vpack.c.bf16 %v73_v10, %v72_v9  ;;  %v826_v14 = vpack.c.bf16 %v91_v12, %v90_v11  ;;  %v75_v16 = vld [vmem:[#allocation5 + $0x28] sm:$0xff]  ;;  %v92_v17 = vld [vmem:[#allocation5 + $0xb0] sm:$0xff]  ;;  %v93_v18 = vld [vmem:[#allocation5 + $0xb8] sm:$0xff] }
  0x3c   :  { %823 = vmatprep.subr.bf16.mxu0 %v822_v8  ;;  %v828_v19 = vpack.c.bf16 %v75_v16, %v74_v15  ;;  %v830_v20 = vpack.c.bf16 %v93_v18, %v92_v17  ;;  %v76_v21 = vld [vmem:[#allocation5 + $0x30] sm:$0xff]  ;;  %v77_v22 = vld [vmem:[#allocation5 + $0x38] sm:$0xff]  ;;  %v94_v23 = vld [vmem:[#allocation5 + $0xc0] sm:$0xff] }
  0x3d   :  { %v95_v24 = vld [vmem:[#allocation5 + $0xc8] sm:$0xff]  ;;  %v832_v26 = vpack.c.bf16 %v77_v22, %v76_v21  ;;  %v78_v27 = vld [vmem:[#allocation5 + $0x40] sm:$0xff]  ;;  %v96_v30 = vld [vmem:[#allocation5 + $0xd0] sm:$0xff] }
  0x3e   :  { %v63_v25 = vld [vmem:[#allocation2 + $0x8] sm:$0xff]  ;;  %v834_v29 = vpack.c.bf16 %v95_v24, %v94_v23  ;;  %v103_v31 = vld [vmem:[#allocation7] sm:$0xff]  ;;  %v97_v33 = vld [vmem:[#allocation5 + $0xd8] sm:$0xff] }
  0x3f   :  { %825 = vmatpush3.bf16.msra.mxu0 %v824_v13  ;;  %190 = vmatprep.mubr.f32.mxu0 %v63_v25  ;;  %v79_v28 = vld [vmem:[#allocation5 + $0x48] sm:$0xff]  ;;  %v105_v35 = vld [vmem:[#allocation7 + $0x10] sm:$0xff]  ;;  %v106_v36 = vld [vmem:[#allocation7 + $0x18] sm:$0xff]  ;;  %v838_v41 = vpack.c.bf16 %v97_v33, %v96_v30 }
  0x40   :  { %827 = vmatprep.subr.bf16.mxu0 %v826_v14  ;;  %v104_v32 = vld [vmem:[#allocation7 + $0x8] sm:$0xff]  ;;  %v854_v37 = vpack.c.bf16 %v106_v36, %v105_v35  ;;  %v107_v38 = vld [vmem:[#allocation7 + $0x20] sm:$0xff]  ;;  %v836_v40 = vpack.c.bf16 %v79_v28, %v78_v27  ;;  %v80_v42 = vld [vmem:[#allocation5 + $0x50] sm:$0xff] }
  0x41   :  { %v850_v34 = vpack.c.bf16 %v104_v32, %v103_v31  ;;  %v108_v39 = vld [vmem:[#allocation7 + $0x28] sm:$0xff]  ;;  %v81_v43 = vld [vmem:[#allocation5 + $0x58] sm:$0xff]  ;;  %v98_v44 = vld [vmem:[#allocation5 + $0xe0] sm:$0xff] }
  0x42   :  { %v99_v45 = vld [vmem:[#allocation5 + $0xe8] sm:$0xff]  ;;  %v858_v46 = vpack.c.bf16 %v108_v39, %v107_v38  ;;  %v109_v47 = vld [vmem:[#allocation7 + $0x30] sm:$0xff]  ;;  %v110_v48 = vld [vmem:[#allocation7 + $0x38] sm:$0xff]  ;;  %v840_v49 = vpack.c.bf16 %v81_v43, %v80_v42 }
  0x43   :  { %829 = vmatpush3.bf16.msra.mxu0 %v828_v19  ;;  %851 = vmatprep.subr.bf16.mxu1 %v850_v34  ;;  %v842_v50 = vpack.c.bf16 %v99_v45, %v98_v44  ;;  %v82_v51 = vld [vmem:[#allocation5 + $0x60] sm:$0xff]  ;;  %v83_v52 = vld [vmem:[#allocation5 + $0x68] sm:$0xff]  ;;  %v100_v53 = vld [vmem:[#allocation5 + $0xf0] sm:$0xff]  ;;  %v862_v55 = vpack.c.bf16 %v110_v48, %v109_v47 }
  0x44   :  { %831 = vmatprep.subr.bf16.mxu0 %v830_v20  ;;  %853 = vmatpush3.bf16.msra.mxu1 %v850_v34  ;;  %v101_v54 = vld [vmem:[#allocation5 + $0xf8] sm:$0xff]  ;;  %v111_v56 = vld [vmem:[#allocation7 + $0x40] sm:$0xff]  ;;  %v112_v57 = vld [vmem:[#allocation7 + $0x48] sm:$0xff]  ;;  %v844_v58 = vpack.c.bf16 %v83_v52, %v82_v51 }
  0x45   :  { %855 = vmatprep.subr.bf16.mxu1 %v854_v37  ;;  %v846_v59 = vpack.c.bf16 %v101_v54, %v100_v53  ;;  %v84_v60 = vld [vmem:[#allocation5 + $0x70] sm:$0xff]  ;;  %v85_v61 = vld [vmem:[#allocation5 + $0x78] sm:$0xff]  ;;  %v866_v62 = vpack.c.bf16 %v112_v57, %v111_v56  ;;  %v62_v0 = vld [vmem:[#allocation2] sm:$0xff] }
  0x46   :  { %v848_v63 = vpack.c.bf16 %v85_v61, %v84_v60  ;;  %v65_v1 = vld [vmem:[#allocation2 + $0x18] sm:$0xff]  ;;  %v64_v2 = vld [vmem:[#allocation2 + $0x10] sm:$0xff]  ;;  %v67_v3 = vld [vmem:[#allocation2 + $0x28] sm:$0xff] }
  0x47   :  { %833 = vmatpush3.bf16.msra.mxu0 %v832_v26  ;;  %v66_v4 = vld [vmem:[#allocation2 + $0x20] sm:$0xff]  ;;  %v69_v5 = vld [vmem:[#allocation2 + $0x38] sm:$0xff]  ;;  %v68_v6 = vld [vmem:[#allocation2 + $0x30] sm:$0xff] }
  0x48   :  { %835 = vmatprep.subr.bf16.mxu0 %v834_v29  ;;  %857 = vmatpush3.bf16.msra.mxu1 %v854_v37  ;;  %v113_v7 = vld [vmem:[#allocation7 + $0x50] sm:$0xff]  ;;  %v114_v8 = vld [vmem:[#allocation7 + $0x58] sm:$0xff]  ;;  %v115_v10 = vld [vmem:[#allocation7 + $0x60] sm:$0xff] }
  0x49   :  { %859 = vmatprep.subr.bf16.mxu1 %v858_v46  ;;  %v870_v9 = vpack.c.bf16 %v114_v8, %v113_v7  ;;  %v116_v11 = vld [vmem:[#allocation7 + $0x68] sm:$0xff]  ;;  %v117_v13 = vld [vmem:[#allocation7 + $0x70] sm:$0xff]  ;;  %v118_v14 = vld [vmem:[#allocation7 + $0x78] sm:$0xff] }
  0x4a   :  { %v874_v12 = vpack.c.bf16 %v116_v11, %v115_v10  ;;  %v878_v15 = vpack.c.bf16 %v118_v14, %v117_v13  ;;  %v670_v17 = vld [vmem:[%s1203_s2] ss:$0 sm:$0xff] }
  0x4b   :  { %837 = vmatpush3.bf16.msra.mxu0 %v836_v40  ;;  %v671_v37 = vld [vmem:[%s1205_s4] ss:$0 sm:$0xff]  ;;  %s1042_s4 = smov [#allocation8]  }
  0x4c   :  { %839 = vmatprep.subr.bf16.mxu0 %v838_v41  ;;  %861 = vmatpush3.bf16.msra.mxu1 %v858_v46  ;;  %v342_v46 = vlaneseq  ;;  %s657_s8 = sshll.u32 %s1042_s4, 4  ;;  %s658_s8 = int_to_ptr.vmem [resolvable:$true] %s657_s8 }
  0x4d   :  { %863 = vmatprep.subr.bf16.mxu1 %v862_v55  ;;  %s1002_s9 = scalar_lea.vmem %s658_s8, 1280  ;;  %p1007_p11 = scmp.lt.s32.totalorder %s658_s8, %s658_s8 }
  0x4e   :  { %v1135_v47 = vand.u32 127, %v342_v46  ;;  %p1003_p10 = scmp.ne.s32.totalorder %s658_s8, %s1002_s9  ;;  %p1008_p12 = scmp.lt.s32.totalorder %s1002_s9, %s1002_s9 }
  0x4f   :  { %841 = vmatpush3.bf16.msra.mxu0 %v840_v49 }
  0x50   :  { %843 = vmatprep.subr.bf16.mxu0 %v842_v50  ;;  %865 = vmatpush3.bf16.msra.mxu1 %v862_v55  ;;  %p1009_p13 = por %p1008_p12, %p1007_p11 }
  0x51   :  { %867 = vmatprep.subr.bf16.mxu1 %v866_v62 }
  0x52   :  { %p1010_p0 = pnand %p1009_p13, %p1003_p10 }
  0x53   :  { %845 = vmatpush3.bf16.msra.mxu0 %v844_v58 }
  0x54   :  { %847 = vmatprep.subr.bf16.mxu0 %v846_v59  ;;  %869 = vmatpush3.bf16.msra.mxu1 %v866_v62 }
  0x55   :  { %871 = vmatprep.subr.bf16.mxu1 %v870_v9 }
  0x57   :  { %849 = vmatpush3.bf16.msra.mxu0 %v848_v63 }
  0x58   :  { %873 = vmatpush3.bf16.msra.mxu1 %v870_v9 }
  0x59   :  { %875 = vmatprep.subr.bf16.mxu1 %v874_v12 }
  0x5a   :  { %191 = vmatmul.mubr.f32.vlgmr.msra.gmra.mrb[0].mxu0 %v62_v0 }
  0x5b   :  { %195 = vmatprep.mubr.f32.mxu0 %v65_v1 }
  0x5c   :  { %877 = vmatpush3.bf16.msra.mxu1 %v874_v12 }
  0x5d   :  { %879 = vmatprep.subr.bf16.mxu1 %v878_v15 }
  0x5e   :  { %196 = vmatmul.mubr.f32.gmra.mrb[2].mxu0 %v64_v2 }
  0x5f   :  { %200 = vmatprep.mubr.f32.mxu0 %v67_v3 }
  0x60   :  { %881 = vmatpush3.bf16.msra.mxu1 %v878_v15 }
  0x62   :  { %201 = vmatmul.mubr.f32.gmra.mrb[4].mxu0 %v66_v4 }
  0x63   :  { %205 = vmatprep.mubr.f32.mxu0 %v69_v5 }
  0x66   :  { %206 = vmatmul.mubr.f32.gmra.mrb[6].mxu0 %v68_v6 }
 0x12d   :  { %v748_v16 = vpop.f32.mrb[0].mxu0 }
 0x12e   :  { %v749_v18 = vpop.f32.mrb[1].mxu0 }
 0x12f   :  { %v750_v19 = vadd.f32 %v749_v18, %v748_v16 }
 0x131   :  { %v193_v20 = vadd.f32 %v750_v19, %v670_v17  ;;  %v751_v21 = vpop.f32.mrb[2].mxu0 }
 0x132   :  { %v752_v22 = vpop.f32.mrb[3].mxu0 }
 0x133   :  { %v1120_v23 = vmax.f32 %v193_v20, 0.0  ;;  %v753_v24 = vadd.f32 %v752_v22, %v751_v21 }
 0x135   :  { %v198_v25 = vadd.f32 %v753_v24, %v670_v17  ;;  %812 = vmatprep.mubr.f32.mxu1 %v1120_v23  ;;  %v754_v26 = vpop.f32.mrb[4].mxu0 }
 0x136   :  { %v755_v27 = vpop.f32.mrb[5].mxu0 }
 0x137   :  { %v1123_v28 = vmax.f32 %v198_v25, 0.0  ;;  %v756_v29 = vadd.f32 %v755_v27, %v754_v26 }
 0x139   :  { %v203_v30 = vadd.f32 %v756_v29, %v670_v17  ;;  %v757_v31 = vpop.f32.mrb[6].mxu0  ;;  %813 = vmatmul.mubr.f32.vlgmr.msra.gmra.mrb[0].mxu1 %v1123_v28  ;;  %v436_v29 = vmul.f32 %v1120_v23, %v1120_v23 }
 0x13a   :  { %v758_v32 = vpop.f32.mrb[7].mxu0 }
 0x13b   :  { %v1126_v33 = vmax.f32 %v203_v30, 0.0  ;;  %v759_v34 = vadd.f32 %v758_v32, %v757_v31  ;;  %v437_v31 = vmul.f32 %v1123_v28, %v1123_v28 }
 0x13d   :  { %v208_v35 = vadd.f32 %v759_v34, %v670_v17  ;;  %815 = vmatprep.mubr.f32.mxu1 %v1126_v33  ;;  %v438_v32 = vmul.f32 %v1126_v33, %v1126_v33 }
 0x13f   :  { %v1129_v36 = vmax.f32 %v208_v35, 0.0 }
 0x141   :  { %816 = vmatmul.mubr.f32.gmra.mrb[2].mxu1 %v1129_v36  ;;  %v439_v34 = vmul.f32 %v1129_v36, %v1129_v36 }
 0x20c   :  { %v814_v38 = vpop.f32.mrb[0].mxu1 }
 0x20d   :  { %v287_v39 = vpop.f32.mrb[1].mxu1  ;;  %v293_v41 = vadd.f32 %v814_v38, %v671_v37 }
 0x20e   :  { %v288_v40 = vadd.f32 %v671_v37, %v287_v39 }
 0x210   :  { %306 = vmax.xlane.f32.xlu0 %v288_v40 }
 0x214   :  { %v817_v42 = vpop.f32.mrb[2].mxu1  ;;  %308 = vmax.xlane.f32.xlu0 %v293_v41 }
 0x215   :  { %v297_v43 = vpop.f32.mrb[3].mxu1  ;;  %v303_v45 = vadd.f32 %v817_v42, %v671_v37 }
 0x216   :  { %v298_v44 = vadd.f32 %v671_v37, %v297_v43 }
 0x218   :  { %310 = vmax.xlane.f32.xlu1 %v298_v44 }
 0x21c   :  { %312 = vmax.xlane.f32.xlu1 %v303_v45 }
 0x29d   :  { %v307_v48 = vpop.xlane.xlu0 %306 }
 0x29e   :  { %v314_v49 = vsub.f32 %v288_v40, %v307_v48  ;;  %vm344_vm0 = vcmp.eq.f32.partialorder %v288_v40, %v307_v48 }
 0x29f   :  { %v348_v50 = vsel %vm344_vm0, %v1135_v47, 128 }
 0x2a0   :  { %v353_v51 = vshra.s32 %v348_v50, 16  ;;  %v318_v52 = vmul.f32 1.442695, %v314_v49  ;;  %v352_v12 = vand.u32 65535, %v348_v50 }
 0x2a1   :  { %v309_v53 = vpop.xlane.xlu0 %308 }
 0x2a2   :  { %v315_v54 = vsub.f32 %v293_v41, %v309_v53  ;;  %vm345_vm1 = vcmp.eq.f32.partialorder %v293_v41, %v309_v53  ;;  %v355_v55 = vcvt.s32.f32 %v353_v51  ;;  %912 = vpow2.f32 %v318_v52 }
 0x2a3   :  { %v349_v56 = vsel %vm345_vm1, %v1135_v47, 128  ;;  %v354_v14 = vcvt.s32.f32 %v352_v12 }
 0x2a4   :  { %356 = vmin.xlane.f32.xlu0 %v355_v55  ;;  %v367_v57 = vshra.s32 %v349_v56, 16  ;;  %v320_v58 = vmul.f32 1.442695, %v315_v54  ;;  %v366_v15 = vand.u32 65535, %v349_v56  ;;  %v1037_v54 = vmov 0.0  }
 0x2a5   :  { %v311_v59 = vpop.xlane.xlu1 %310 }
 0x2a6   :  { %v316_v60 = vsub.f32 %v298_v44, %v311_v59  ;;  %vm346_vm2 = vcmp.eq.f32.partialorder %v298_v44, %v311_v59  ;;  %v369_v61 = vcvt.s32.f32 %v367_v57  ;;  %914 = vpow2.f32 %v320_v58 }
 0x2a7   :  { %v350_v62 = vsel %vm346_vm2, %v1135_v47, 128  ;;  %v368_v18 = vcvt.s32.f32 %v366_v15 }
 0x2a8   :  { %v322_v63 = vmul.f32 1.442695, %v316_v60  ;;  %370 = vmin.xlane.f32.xlu1 %v369_v61  ;;  %v381_v0 = vshra.s32 %v350_v62, 16  ;;  %v380_v19 = vand.u32 65535, %v350_v62 }
 0x2a9   :  { %v313_v1 = vpop.xlane.xlu1 %312 }
 0x2aa   :  { %916 = vpow2.f32 %v322_v63  ;;  %v317_v2 = vsub.f32 %v303_v45, %v313_v1  ;;  %vm347_vm3 = vcmp.eq.f32.partialorder %v303_v45, %v313_v1  ;;  %v383_v3 = vcvt.s32.f32 %v381_v0 }
 0x2ab   :  { %v351_v4 = vsel %vm347_vm3, %v1135_v47, 128  ;;  %v382_v22 = vcvt.s32.f32 %v380_v19 }
 0x2ac   :  { %v324_v5 = vmul.f32 1.442695, %v317_v2  ;;  %384 = vmin.xlane.f32.xlu0 %v383_v3  ;;  %v395_v6 = vshra.s32 %v351_v4, 16  ;;  %v913_v8 = vpop.eup %912  ;;  %v394_v24 = vand.u32 65535, %v351_v4 }
 0x2ae   :  { %918 = vpow2.f32 %v324_v5  ;;  %v397_v7 = vcvt.s32.f32 %v395_v6  ;;  %v396_v27 = vcvt.s32.f32 %v394_v24 }
 0x2b0   :  { %326 = vadd.xlane.f32.xlu0 %v913_v8  ;;  %398 = vmin.xlane.f32.xlu1 %v397_v7  ;;  %v1141_v9 = vpop.eup %914 }
 0x2b4   :  { %v1143_v10 = vpop.eup %916  ;;  %328 = vadd.xlane.f32.xlu1 %v1141_v9 }
 0x2b5   :  { %330 = vadd.xlane.f32.xlu0 %v1143_v10 }
 0x2b8   :  { %v1147_v11 = vpop.eup %918 }
 0x2b9   :  { %332 = vadd.xlane.f32.xlu1 %v1147_v11 }
 0x331   :  { %v357_v13 = vpop.xlane.xlu0 %356 }
 0x332   :  { %vm358_vm4 = vcmp.eq.f32.partialorder %v355_v55, %v357_v13  ;;  %v363_v39 = vcvt.f32.s32 %v357_v13 }
 0x333   :  { %v359_v16 = vsel %vm358_vm4, %v354_v14, inf }
 0x334   :  { %360 = vmin.xlane.f32.xlu0 %v359_v16  ;;  %v364_v42 = vshll.u32 %v363_v39, 16 }
 0x335   :  { %v371_v17 = vpop.xlane.xlu1 %370 }
 0x336   :  { %vm372_vm5 = vcmp.eq.f32.partialorder %v369_v61, %v371_v17  ;;  %v377_v43 = vcvt.f32.s32 %v371_v17 }
 0x337   :  { %v373_v20 = vsel %vm372_vm5, %v368_v18, inf }
 0x338   :  { %374 = vmin.xlane.f32.xlu1 %v373_v20  ;;  %v378_v50 = vshll.u32 %v377_v43, 16  ;;  %v1038_v20 = vmov 2  }
 0x339   :  { %v385_v21 = vpop.xlane.xlu0 %384  ;;  %899 = vset.pattern.permute.xlu0 %v1038_v20 }
 0x33a   :  { %vm386_vm6 = vcmp.eq.f32.partialorder %v383_v3, %v385_v21  ;;  %v391_v48 = vcvt.f32.s32 %v385_v21  ;;  %v1039_v21 = vmov 0  }
 0x33b   :  { %v387_v25 = vsel %vm386_vm6, %v382_v22, inf  ;;  %897 = vset.pattern.permute.xlu1 %v1039_v21 }
 0x33c   :  { %388 = vmin.xlane.f32.xlu0 %v387_v25  ;;  %v392_v58 = vshll.u32 %v391_v48, 16 }
 0x33d   :  { %v399_v26 = vpop.xlane.xlu1 %398  ;;  %v327_v35 = vpop.xlane.xlu0 %326 }
 0x33e   :  { %vm400_vm7 = vcmp.eq.f32.partialorder %v397_v7, %v399_v26  ;;  %920 = vrcp.f32 %v327_v35  ;;  %v405_v59 = vcvt.f32.s32 %v399_v26 }
 0x33f   :  { %v401_v30 = vsel %vm400_vm7, %v396_v27, inf }
 0x340   :  { %402 = vmin.xlane.f32.xlu1 %v401_v30  ;;  %440 = vadd.xlane.f32.xlu0 %v436_v29  ;;  %v406_v4 = vshll.u32 %v405_v59, 16 }
 0x341   :  { %v329_v37 = vpop.xlane.xlu1 %328 }
 0x342   :  { %922 = vrcp.f32 %v329_v37  ;;  %v331_v38 = vpop.xlane.xlu0 %330 }
 0x343   :  { %924 = vrcp.f32 %v331_v38 }
 0x344   :  { %442 = vadd.xlane.f32.xlu1 %v437_v31  ;;  %444 = vadd.xlane.f32.xlu0 %v438_v32 }
 0x346   :  { %v333_v40 = vpop.xlane.xlu1 %332 }
 0x347   :  { %926 = vrcp.f32 %v333_v40 }
 0x348   :  { %446 = vadd.xlane.f32.xlu1 %v439_v34  ;;  %v921_v45 = vpop.eup %920 }
 0x349   :  { %v338_v52 = vmul.f32 %v921_v45, %v913_v8 }
 0x34c   :  { %v923_v53 = vpop.eup %922 }
 0x34d   :  { %v339_v63 = vmul.f32 %v923_v53, %v1141_v9  ;;  %v925_v0 = vpop.eup %924 }
 0x34e   :  { %v340_v8 = vmul.f32 %v925_v0, %v1143_v10 }
 0x351   :  { %v927_v12 = vpop.eup %926 }
 0x352   :  { %v341_v16 = vmul.f32 %v927_v12, %v1147_v11 }
 0x3c1   :  { %v361_v41 = vpop.xlane.xlu0 %360 }
 0x3c2   :  { %v362_v44 = vcvt.f32.s32 %v361_v41 }
 0x3c4   :  { %v365_v46 = vadd.s32 %v364_v42, %v362_v44 }
 0x3c5   :  { %v375_v49 = vpop.xlane.xlu1 %374 }
 0x3c6   :  { %vm408_vm8 = vcmp.eq.s32.totalorder %v1135_v47, %v365_v46  ;;  %v376_v51 = vcvt.f32.s32 %v375_v49 }
 0x3c7   :  { %v672_v55 = vsel %vm408_vm8, 1.0, %v1037_v54 }
 0x3c8   :  { %v379_v56 = vadd.s32 %v378_v50, %v376_v51  ;;  %v420_v57 = vsub.f32 %v338_v52, %v672_v55  ;;  %v1040_v52 = vmov 1  }
 0x3c9   :  { %v389_v60 = vpop.xlane.xlu0 %388 }
 0x3ca   :  { %vm409_vm9 = vcmp.eq.s32.totalorder %v1135_v47, %v379_v56  ;;  %v390_v61 = vcvt.f32.s32 %v389_v60  ;;  %v424_v62 = vmul.f32 %v420_v57, %v420_v57 }
 0x3cb   :  { %v673_v1 = vsel %vm409_vm9, 1.0, %v1037_v54 }
 0x3cc   :  { %v393_v2 = vadd.s32 %v392_v58, %v390_v61  ;;  %428 = vadd.xlane.f32.xlu0 %v424_v62  ;;  %v421_v3 = vsub.f32 %v339_v63, %v673_v1 }
 0x3cd   :  { %v403_v5 = vpop.xlane.xlu1 %402  ;;  %v441_v10 = vpop.xlane.xlu0 %440 }
 0x3ce   :  { %vm410_vm10 = vcmp.eq.s32.totalorder %v1135_v47, %v393_v2  ;;  %v404_v6 = vcvt.f32.s32 %v403_v5  ;;  %v425_v7 = vmul.f32 %v421_v3, %v421_v3  ;;  %v448_v25 = vadd.f32 1.0, %v441_v10 }
 0x3cf   :  { %v674_v13 = vsel %vm410_vm10, 1.0, %v1037_v54 }
 0x3d0   :  { %v407_v14 = vadd.s32 %v406_v4, %v404_v6  ;;  %430 = vadd.xlane.f32.xlu1 %v425_v7  ;;  %v422_v15 = vsub.f32 %v340_v8, %v674_v13 }
 0x3d1   :  { %v443_v22 = vpop.xlane.xlu1 %442  ;;  %v445_v24 = vpop.xlane.xlu0 %444 }
 0x3d2   :  { %vm411_vm11 = vcmp.eq.s32.totalorder %v1135_v47, %v407_v14  ;;  %v426_v9 = vmul.f32 %v422_v15, %v422_v15  ;;  %v449_v29 = vadd.f32 1.0, %v443_v22  ;;  %v450_v32 = vadd.f32 1.0, %v445_v24 }
 0x3d3   :  { %v675_v17 = vsel %vm411_vm11, 1.0, %v1037_v54 }
 0x3d4   :  { %432 = vadd.xlane.f32.xlu0 %v426_v9  ;;  %v423_v18 = vsub.f32 %v341_v16, %v675_v17 }
 0x3d5   :  { %v447_v26 = vpop.xlane.xlu1 %446 }
 0x3d6   :  { %v427_v19 = vmul.f32 %v423_v18, %v423_v18  ;;  %v451_v38 = vadd.f32 1.0, %v447_v26 }
 0x3d8   :  { %434 = vadd.xlane.f32.xlu1 %v427_v19 }
 0x459   :  { %v429_v47 = vpop.xlane.xlu0 %428 }
 0x45a   :  { %v452_v27 = vmul.f32 %v448_v25, %v429_v47 }
 0x45c   :  { %v456_v11 = vadd.f32 1e-12, %v452_v27 }
 0x45d   :  { %v431_v30 = vpop.xlane.xlu1 %430 }
 0x45e   :  { %928 = vrsqrt.f32 %v456_v11  ;;  %v453_v31 = vmul.f32 %v449_v29, %v431_v30 }
 0x460   :  { %v457_v34 = vadd.f32 1e-12, %v453_v31 }
 0x461   :  { %v433_v35 = vpop.xlane.xlu0 %432 }
 0x462   :  { %930 = vrsqrt.f32 %v457_v34  ;;  %v454_v37 = vmul.f32 %v450_v32, %v433_v35 }
 0x464   :  { %v458_v39 = vadd.f32 1e-12, %v454_v37 }
 0x465   :  { %v435_v40 = vpop.xlane.xlu1 %434 }
 0x466   :  { %932 = vrsqrt.f32 %v458_v39  ;;  %v455_v41 = vmul.f32 %v451_v38, %v435_v40 }
 0x468   :  { %v929_v42 = vpop.eup %928  ;;  %v459_v43 = vadd.f32 1e-12, %v455_v41 }
 0x469   :  { %v464_v44 = vmul.f32 %v929_v42, %v420_v57  ;;  %v1041_v57 = vmov 3  }
 0x46a   :  { %934 = vrsqrt.f32 %v459_v43 }
 0x46b   :  { %v712_v45 = vpack.c.bf16 %v464_v44, %v464_v44 }
 0x46c   :  { %v931_v46 = vpop.eup %930 }
 0x46d   :  { %v465_v48 = vmul.f32 %v931_v46, %v421_v3  ;;  %648 = vst [vmem:[#allocation8 + $0x10] sm:$0xf] %v712_v45 }
 0x46f   :  { %475 = vperm.xlu1 %897, %v465_v48   ;;  %v713_v49 = vpack.c.bf16 %v465_v48, %v465_v48  ;;  %557 = vperm.xlu0 %899, %v465_v48  }
 0x470   :  { %v933_v50 = vpop.eup %932 }
 0x471   :  { %649 = vst [vmem:[#allocation8 + $0x24] sm:$0xf] %v713_v49  ;;  %v466_v51 = vmul.f32 %v933_v50, %v422_v15 }
 0x473   :  { %898 = vset.pattern.permute.xlu1 %v1040_v52  ;;  %901 = vset.pattern.permute.xlu0 %v1039_v21  ;;  %v714_v53 = vpack.c.bf16 %v466_v51, %v466_v51 }
 0x474   :  { %v935_v54 = vpop.eup %934  ;;  %517 = vperm.xlu1 %898, %v465_v48   ;;  %470 = vperm.xlu0 %901, %v464_v44  }
 0x475   :  { %v467_v55 = vmul.f32 %v935_v54, %v423_v18  ;;  %650 = vst [vmem:[#allocation8 + $0x38] sm:$0xf] %v714_v53 }
 0x477   :  { %v715_v56 = vpack.c.bf16 %v467_v55, %v467_v55 }
 0x478   :  { %900 = vset.pattern.permute.xlu1 %v1041_v57  ;;  %904 = vset.pattern.permute.xlu0 %v1041_v57 }
 0x479   :  { %597 = vperm.xlu1 %900, %v465_v48   ;;  %593 = vperm.xlu0 %904, %v464_v44   ;;  %651 = vst [vmem:[#allocation8 + $0x4c] sm:$0xf] %v715_v56 }
 0x47d   :  { %902 = vset.pattern.permute.xlu1 %v1040_v52  ;;  %605 = vperm.xlu0 %904, %v467_v55  }
 0x47e   :  { %513 = vperm.xlu1 %902, %v464_v44  }
 0x482   :  { %903 = vset.pattern.permute.xlu1 %v1038_v20 }
 0x483   :  { %553 = vperm.xlu1 %903, %v464_v44  }
 0x487   :  { %905 = vset.pattern.permute.xlu1 %v1039_v21 }
 0x488   :  { %485 = vperm.xlu1 %905, %v467_v55  }
 0x48c   :  { %906 = vset.pattern.permute.xlu1 %v1040_v52 }
 0x48d   :  { %525 = vperm.xlu1 %906, %v467_v55  }
 0x491   :  { %907 = vset.pattern.permute.xlu1 %v1038_v20 }
 0x492   :  { %565 = vperm.xlu1 %907, %v467_v55  }
 0x496   :  { %908 = vset.pattern.permute.xlu1 %v1039_v21 }
 0x497   :  { %480 = vperm.xlu1 %908, %v466_v51  }
 0x49b   :  { %909 = vset.pattern.permute.xlu1 %v1040_v52 }
 0x49c   :  { %521 = vperm.xlu1 %909, %v466_v51  }
 0x4a0   :  { %910 = vset.pattern.permute.xlu1 %v1038_v20 }
 0x4a1   :  { %561 = vperm.xlu1 %910, %v466_v51  }
 0x4a5   :  { %911 = vset.pattern.permute.xlu1 %v1041_v57 }
 0x4a6   :  { %601 = vperm.xlu1 %911, %v466_v51  }
 0x4ee   :  { %v476_v58 = vpop.permute.xlu1 %475  ;;  %v558_v59 = vpop.permute.xlu0 %557 }
 0x4ef   :  { %v489_v60 = vmul.f32 %v476_v58, %v1123_v28  ;;  %v569_v61 = vmul.f32 %v558_v59, %v1123_v28 }
 0x4f1   :  { %v697_v62 = vpack.c.bf16 %v489_v60, %v489_v60  ;;  %v705_v63 = vpack.c.bf16 %v569_v61, %v569_v61 }
 0x4f3   :  { %509 = vst [vmem:[#allocation8 + $0x14] sm:$0xf] %v697_v62  ;;  %589 = vst [vmem:[#allocation8 + $0x1c] sm:$0xf] %v705_v63  ;;  %v518_v0 = vpop.permute.xlu1 %517  ;;  %v471_v1 = vpop.permute.xlu0 %470 }
 0x4f4   :  { %v529_v2 = vmul.f32 %v518_v0, %v1123_v28  ;;  %v488_v3 = vmul.f32 %v471_v1, %v1120_v23 }
 0x4f6   :  { %v701_v4 = vpack.c.bf16 %v529_v2, %v529_v2  ;;  %v696_v5 = vpack.c.bf16 %v488_v3, %v488_v3 }
 0x4f8   :  { %549 = vst [vmem:[#allocation8 + $0x18] sm:$0xf] %v701_v4  ;;  %508 = vst [vmem:[#allocation8] sm:$0xf] %v696_v5  ;;  %v598_v6 = vpop.permute.xlu1 %597  ;;  %v594_v7 = vpop.permute.xlu0 %593 }
 0x4f9   :  { %v609_v8 = vmul.f32 %v598_v6, %v1123_v28  ;;  %v608_v12 = vmul.f32 %v594_v7, %v1120_v23 }
 0x4fb   :  { %v709_v13 = vpack.c.bf16 %v609_v8, %v609_v8  ;;  %v708_v14 = vpack.c.bf16 %v608_v12, %v608_v12 }
 0x4fc   :  { %v606_v15 = vpop.permute.xlu0 %605 }
 0x4fd   :  { %629 = vst [vmem:[#allocation8 + $0x20] sm:$0xf] %v709_v13  ;;  %628 = vst [vmem:[#allocation8 + $0xc] sm:$0xf] %v708_v14  ;;  %v611_v9 = vmul.f32 %v606_v15, %v1129_v36  ;;  %v514_v16 = vpop.permute.xlu1 %513 }
 0x4fe   :  { %v528_v17 = vmul.f32 %v514_v16, %v1120_v23 }
 0x4ff   :  { %v711_v18 = vpack.c.bf16 %v611_v9, %v611_v9 }
 0x500   :  { %v700_v19 = vpack.c.bf16 %v528_v17, %v528_v17 }
 0x501   :  { %631 = vst [vmem:[#allocation8 + $0x48] sm:$0xf] %v711_v18 }
 0x502   :  { %548 = vst [vmem:[#allocation8 + $0x4] sm:$0xf] %v700_v19  ;;  %v554_v20 = vpop.permute.xlu1 %553 }
 0x503   :  { %v568_v21 = vmul.f32 %v554_v20, %v1120_v23 }
 0x505   :  { %v704_v28 = vpack.c.bf16 %v568_v21, %v568_v21 }
 0x507   :  { %588 = vst [vmem:[#allocation8 + $0x8] sm:$0xf] %v704_v28  ;;  %v486_v10 = vpop.permute.xlu1 %485 }
 0x508   :  { %v491_v22 = vmul.f32 %v486_v10, %v1129_v36 }
 0x50a   :  { %v699_v24 = vpack.c.bf16 %v491_v22, %v491_v22 }
 0x50c   :  { %511 = vst [vmem:[#allocation8 + $0x3c] sm:$0xf] %v699_v24  ;;  %v526_v25 = vpop.permute.xlu1 %525 }
 0x50d   :  { %v531_v26 = vmul.f32 %v526_v25, %v1129_v36 }
 0x50f   :  { %v703_v47 = vpack.c.bf16 %v531_v26, %v531_v26 }
 0x511   :  { %551 = vst [vmem:[#allocation8 + $0x40] sm:$0xf] %v703_v47  ;;  %v566_v27 = vpop.permute.xlu1 %565 }
 0x512   :  { %v571_v29 = vmul.f32 %v566_v27, %v1129_v36 }
 0x514   :  { %v707_v11 = vpack.c.bf16 %v571_v29, %v571_v29 }
 0x516   :  { %591 = vst [vmem:[#allocation8 + $0x44] sm:$0xf] %v707_v11  ;;  %v481_v30 = vpop.permute.xlu1 %480 }
 0x517   :  { %v490_v23 = vmul.f32 %v481_v30, %v1126_v33 }
 0x519   :  { %v698_v31 = vpack.c.bf16 %v490_v23, %v490_v23 }
 0x51b   :  { %510 = vst [vmem:[#allocation8 + $0x28] sm:$0xf] %v698_v31  ;;  %v522_v32 = vpop.permute.xlu1 %521 }
 0x51c   :  { %v530_v34 = vmul.f32 %v522_v32, %v1126_v33 }
 0x51e   :  { %v702_v35 = vpack.c.bf16 %v530_v34, %v530_v34 }
 0x520   :  { %550 = vst [vmem:[#allocation8 + $0x2c] sm:$0xf] %v702_v35  ;;  %v562_v37 = vpop.permute.xlu1 %561 }
 0x521   :  { %v570_v38 = vmul.f32 %v562_v37, %v1126_v33 }
 0x523   :  { %v706_v39 = vpack.c.bf16 %v570_v38, %v570_v38 }
 0x525   :  { %590 = vst [vmem:[#allocation8 + $0x30] sm:$0xf] %v706_v39  ;;  %v602_v40 = vpop.permute.xlu1 %601 }
 0x526   :  { %v610_v36 = vmul.f32 %v602_v40, %v1126_v33 }
 0x528   :  { %v710_v41 = vpack.c.bf16 %v610_v36, %v610_v36 }
 0x52a   :  { %630 = vst [vmem:[#allocation8 + $0x34] sm:$0xf] %v710_v41 }
 0x52b   :  { %1013 = shalt.err (!%p1010_p0)
}
 0x52c   :  { %s1014_s12 = scalar_lea.hbm %s1206_s5, 1280 }
 0x52d   :  { %p1015_p1 = scmp.ne.s32.totalorder %s1206_s5, %s1014_s12  ;;  %p1018_p2 = scmp.lt.u32.totalorder %s1014_s12, %s1206_s5 }
 0x52f   :  { %p1020_p3 = pnand %p1018_p2, %p1015_p1 }
 0x531   :  { %1023 = shalt.err (!%p1020_p3)
}
 0x532   :  { %s1043_s1 = smov 320   ;;  %s1044_s17 = smov 20  }
 0x533   :  { %663 = dma.vmem_to_hbm [thread:$0]  %s658_s8, 1280, %s1206_s5, [#allocation4], %s1043_s1, %s1043_s1, %s1044_s17  }
 0x534   :  { %1028 = dma.done.wait [#allocation4], 1280  }
 0x535   :  { %1029 = vsyncadd [#allocation4], 4294966016 }
 0x536   :  { %667 = vsyncpa [#allocation3], 1 }
 0x537   :  { %668 = vsyncpa [#allocation6], 1 }
 0x538   :  { %669 = vsyncpa [#allocation4], 1 }

</bundles_post_ra>
